<compile_context>
chip_gen: v7x
topology: tpu7x:2x2x1
jax: 0.10.0
libtpu: 0.0.40
codegen_flags: <defaults>
</compile_context>

<pallas_src>
import functools

import jax
import jax.numpy as jnp
from jax.experimental import pallas as pl
from jax.experimental.pallas import tpu as pltpu

_LANE = 128
_TARGET_BLOCK_BYTES = 4 * 1024 * 1024   # ~4 MiB per input buffer per grid step
_VMEM_LIMIT_BYTES = 32 * 1024 * 1024    # 3 arrays x 2 buffers x 4 MiB + headroom


def _quant_add_kernel(q_ref, x1_ref, x2_ref, o_ref, *, use_act_quant: bool):
    """q_ref: SMEM f32[8] = [inv_d1, lo1, hi1, d1, inv_d2, lo2, hi2, d2]."""
    x1 = x1_ref[...]
    x2 = x2_ref[...]
    if use_act_quant:
        inv_d1, lo1, hi1, d1 = q_ref[0], q_ref[1], q_ref[2], q_ref[3]
        inv_d2, lo2, hi2, d2 = q_ref[4], q_ref[5], q_ref[6], q_ref[7]
        # Zero point folded into the clamp bounds:
        #   clamp(round(x/d) + z, 0, qmax) - z == clamp(round(x/d), -z, qmax-z)
        x1 = jnp.clip(jnp.round(x1 * inv_d1), lo1, hi1) * d1
        x2 = jnp.clip(jnp.round(x2 * inv_d2), lo2, hi2) * d2
    # Quant math promotes to f32 (numerically safe); cast back on the store.
    o_ref[...] = (x1 + x2).astype(o_ref.dtype)


def _pack_qparams(q_params, n_bits):
    """[delta, zp] -> [1/delta, -zp, qmax - zp, delta] (host-side, f32)."""
    q = q_params.astype(jnp.float32)
    delta, zp = q[0], q[1]
    qmax = jnp.float32(2 ** n_bits - 1)
    return jnp.stack([1.0 / delta, -zp, qmax - zp, delta])


def _fake_quant_jax(x, q_params, n_bits):
    """Pure-JAX fake-quant for the tiny (<128 elem) ragged tail."""
    q = q_params.astype(jnp.float32)
    delta, zp = q[0], q[1]
    qmax = 2.0 ** n_bits - 1.0
    x_int = jnp.clip(jnp.round(x.astype(jnp.float32) / delta) + zp, 0.0, qmax)
    return (x_int - zp) * delta


def _choose_slab(n_main, itemsize):
    """Lane-dense (rows, width) slab + block row count for the aligned prefix."""
    width = _LANE
    for w in (4096, 2048, 1024, 512, 256, 128):
        if n_main % w == 0:
            width = w
            break
    rows = n_main // width

    # ~4 MiB per buffer; row counts that are multiples of 32 are sublane-legal
    # for f32 / bf16 / int8 alike.
    target_rows = max(32, (_TARGET_BLOCK_BYTES // (width * itemsize)) // 32 * 32)
    if rows > target_rows:
        block_rows = target_rows
    elif rows >= 64:
        # Split small arrays into >= 2 blocks: gives v7x's second TensorCore
        # work to shard and lets the pipeline overlap DMA with compute.
        half = (rows + 1) // 2
        block_rows = ((half + 31) // 32) * 32
    else:
        block_rows = rows  # full-dim block: always legal regardless of size
    return width, rows, block_rows


def _quant_add_slab(a, b, qpacked, use_act_quant, block_rows, width):
    rows = a.shape[0]
    n = a.size
    itemsize = jnp.dtype(a.dtype).itemsize
    kernel = functools.partial(_quant_add_kernel, use_act_quant=use_act_quant)
    return pl.pallas_call(
        kernel,
        out_shape=jax.ShapeDtypeStruct((rows, width), a.dtype),
        grid=(pl.cdiv(rows, block_rows),),
        in_specs=[
            pl.BlockSpec(memory_space=pltpu.MemorySpace.SMEM),  # packed qparams
            pl.BlockSpec((block_rows, width), lambda i: (i, 0)),
            pl.BlockSpec((block_rows, width), lambda i: (i, 0)),
        ],
        out_specs=pl.BlockSpec((block_rows, width), lambda i: (i, 0)),
        compiler_params=pltpu.CompilerParams(
            dimension_semantics=("parallel",),
            vmem_limit_bytes=_VMEM_LIMIT_BYTES),
        cost_estimate=pl.CostEstimate(
            flops=n * (13 if use_act_quant else 1),
            transcendentals=0,
            bytes_accessed=3 * n * itemsize),
    )(qpacked, a, b)


def quant_add(x1, x2, q1_params, q2_params, *, use_act_quant=False, n_bits=8):
    """QuantAdd.forward. q*_params = f32[2] = [delta, zero_point] (per-tensor)."""
    assert x1.shape == x2.shape and x1.dtype == x2.dtype
    orig_shape = x1.shape
    n = x1.size
    itemsize = jnp.dtype(x1.dtype).itemsize

    qpacked = jnp.concatenate(
        [_pack_qparams(q1_params, n_bits), _pack_qparams(q2_params, n_bits)])

    flat1 = x1.reshape(-1)
    flat2 = x2.reshape(-1)

    tail = n % _LANE            # rare ragged remainder (< 128 elements)
    n_main = n - tail

    pieces = []
    if n_main:
        width, rows, block_rows = _choose_slab(n_main, itemsize)
        a = (flat1 if tail == 0 else flat1[:n_main]).reshape(rows, width)
        b = (flat2 if tail == 0 else flat2[:n_main]).reshape(rows, width)
        pieces.append(
            _quant_add_slab(a, b, qpacked, use_act_quant,
                            block_rows, width).reshape(-1))
    if tail:
        # Tiny ragged tail handled off the hot path (no jnp.pad of full inputs).
        t1 = flat1[n_main:]
        t2 = flat2[n_main:]
        if use_act_quant:
            t1 = _fake_quant_jax(t1, q1_params, n_bits)
            t2 = _fake_quant_jax(t2, q2_params, n_bits)
        pieces.append((t1 + t2).astype(x1.dtype))

    out_flat = pieces[0] if len(pieces) == 1 else jnp.concatenate(pieces)
    return out_flat.reshape(orig_shape)


if __name__ == "__main__":
    key = jax.random.PRNGKey(0)
    k1, k2, k3, k4, k5, k6 = jax.random.split(key, 6)

    # NCHW activations, like the PyTorch module's typical inputs.
    shape = (2, 4, 16, 16)
    x1 = jax.random.normal(k1, shape, dtype=jnp.float32)
    x2 = jax.random.normal(k2, shape, dtype=jnp.float32)

    # Deterministic synthetic per-tensor quantizer params [delta, zero_point].
    q1 = jnp.array([0.05, 128.0], dtype=jnp.float32)
    q2 = jnp.array([0.04, 128.0], dtype=jnp.float32)

    def ref_fake_quant(x, qp, n_bits=8):
        xi = jnp.clip(jnp.round(x / qp[0]) + qp[1], 0.0, 2 ** n_bits - 1)
        return (xi - qp[1]) * qp[0]

    # Default module state: use_act_quant = False  ->  plain x1 + x2.
    out = quant_add(x1, x2, q1, q2, use_act_quant=False)
    jax.block_until_ready(out)
    assert out.shape == shape and out.dtype == x1.dtype
    assert jnp.allclose(out, x1 + x2, atol=1e-6)

    # Quantized path (use_act_quant = True).
    out_q = quant_add(x1, x2, q1, q2, use_act_quant=True)
    jax.block_until_ready(out_q)
    ref_q = ref_fake_quant(x1, q1) + ref_fake_quant(x2, q2)
    assert jnp.allclose(out_q, ref_q, atol=1e-5)

    # Larger aligned shape exercises the multi-block "parallel" grid path.
    shape_b = (8, 32, 32, 32)
    y1 = jax.random.normal(k3, shape_b, dtype=jnp.float32)
    y2 = jax.random.normal(k4, shape_b, dtype=jnp.float32)
    out_b = quant_add(y1, y2, q1, q2, use_act_quant=False)
    jax.block_until_ready(out_b)
    assert jnp.allclose(out_b, y1 + y2, atol=1e-6)

    # Ragged element counts: (3,5,7) -> pure tail; (5,7,13) -> prefix + tail.
    for shape_r in ((3, 5, 7), (5, 7, 13)):
        z1 = jax.random.normal(k5, shape_r, dtype=jnp.float32)
        z2 = jax.random.normal(k6, shape_r, dtype=jnp.float32)
        out_r = quant_add(z1, z2, q1, q2, use_act_quant=True)
        jax.block_until_ready(out_r)
        ref_r = ref_fake_quant(z1, q1) + ref_fake_quant(z2, q2)
        assert out_r.shape == shape_r
        assert jnp.allclose(out_r, ref_r, atol=1e-5)

    print("KERNEL_OK")
</pallas_src>

<mosaic_0001>
module attributes {stable_mosaic.version = 11 : i64} {
  func.func @_quant_add_kernel(%arg0: i32, %arg1: memref<8xf32, #tpu.memory_space<smem>>, %arg2: memref<1x2048xf32, #tpu.memory_space<vmem>>, %arg3: memref<1x2048xf32, #tpu.memory_space<vmem>>, %arg4: memref<1x2048xf32, #tpu.memory_space<vmem>>) attributes {dimension_semantics = [#tpu.dimension_semantics<parallel>], iteration_bounds = array<i64: 1>, scalar_prefetch = 0 : i64, scratch_operands = 0 : i64, tpu.core_type = #tpu.core_type<tc>, window_params = [{transform_indices = @transform_0, window_bounds = array<i64: 8>}, {transform_indices = @transform_1, window_bounds = array<i64: 1, 2048>}, {transform_indices = @transform_2, window_bounds = array<i64: 1, 2048>}, {transform_indices = @transform_3, window_bounds = array<i64: 1, 2048>}]} {
    %c0 = arith.constant 0 : index
    %c0_0 = arith.constant 0 : index
    %0 = vector.load %arg2[%c0, %c0_0] : memref<1x2048xf32, #tpu.memory_space<vmem>>, vector<1x2048xf32>
    %c0_1 = arith.constant 0 : index
    %c0_2 = arith.constant 0 : index
    %1 = vector.load %arg3[%c0_1, %c0_2] : memref<1x2048xf32, #tpu.memory_space<vmem>>, vector<1x2048xf32>
    %2 = arith.addf %0, %1 : vector<1x2048xf32>
    %c0_3 = arith.constant 0 : index
    %c0_4 = arith.constant 0 : index
    %3 = vector.load %arg4[%c0_3, %c0_4] : memref<1x2048xf32, #tpu.memory_space<vmem>>, vector<1x2048xf32>
    tpu.vector_store %arg4[%c0_3, %c0_4], %2 {strides = array<i32>} : memref<1x2048xf32, #tpu.memory_space<vmem>>, vector<1x2048xf32>,
    return
  }
  func.func @transform_0(%arg0: i32) -> i32 {
    %c0_i32 = arith.constant 0 : i32
    %c0_i32_0 = arith.constant 0 : i32
    return %c0_i32 : i32
  }
  func.func @transform_1(%arg0: i32) -> (i32, i32) {
    %c0_i32 = arith.constant 0 : i32
    %c0_i32_0 = arith.constant 0 : i32
    return %arg0, %c0_i32 : i32, i32
  }
  func.func @transform_2(%arg0: i32) -> (i32, i32) {
    %c0_i32 = arith.constant 0 : i32
    %c0_i32_0 = arith.constant 0 : i32
    return %arg0, %c0_i32 : i32, i32
  }
  func.func @transform_3(%arg0: i32) -> (i32, i32) {
    %c0_i32 = arith.constant 0 : i32
    %c0_i32_0 = arith.constant 0 : i32
    return %arg0, %c0_i32 : i32, i32
  }
}

</mosaic_0001>

<bundles_post_ra>
// kernel: tpu_custom_call.1
= control target key start
LH: loop header
LB: loop body
LE: loop exit
PB: predicated region body
PF: predicated region fallthrough
CT: control target
= control target key end

     0   :  { %8 = vsyncpa [#allocation5], 0  ;;  %s235_s0 = inlined_call_operand.hbm [shape: f32[8], index: 0, kind: input, shape index: {}]   ;;  %s236_s1 = inlined_call_operand.hbm [shape: f32[1,2048], index: 1, kind: input, shape index: {}]   ;;  %s237_s2 = inlined_call_operand.hbm [shape: f32[1,2048], index: 2, kind: input, shape index: {}]   ;;  %s238_s3 = inlined_call_operand.hbm [shape: f32[1,2048], index: 3, kind: output, shape index: {}]  }
   0x1   :  { %9 = vsyncpa [#allocation3], 0 }
   0x2   :  { %10 = vsyncpa [#allocation8], 0 }
   0x3   :  { %11 = vsyncpa [#allocation4], 0  ;;  %s79_s14 = scalar_lea.hbm %s235_s0, 16 }
   0x4   :  { %p80_p0 = scmp.ne.s32.totalorder %s235_s0, %s79_s14  ;;  %p83_p1 = scmp.lt.u32.totalorder %s79_s14, %s235_s0 }
   0x6   :  { %p85_p2 = pnand %p83_p1, %p80_p0 }
   0x8   :  { %88 = shalt.err (!%p85_p2)
}
   0x9   :  { %s163_s19 = smov [#allocation2]   ;;  %s164_s22 = smov [#allocation6]  }
   0xa   :  { %19 = dma.hbm_to_smem %s235_s0, 16, %s163_s19, [#allocation5]  }
   0xb   :  { %s26_s23 = sshll.u32 %s164_s22, 4  ;;  %s165_s24 = smov [#allocation7]   ;;  %s27_s23 = int_to_ptr.vmem [resolvable:$true] %s26_s23 }
   0xc   :  { %s36_s25 = sshll.u32 %s165_s24, 4  ;;  %s89_s28 = scalar_lea.hbm %s236_s1, 256  ;;  %s37_s25 = int_to_ptr.vmem [resolvable:$true] %s36_s25 }
   0xd   :  { %p90_p3 = scmp.ne.s32.totalorder %s236_s1, %s89_s28  ;;  %p93_p4 = scmp.lt.u32.totalorder %s89_s28, %s236_s1 }
   0xf   :  { %p95_p5 = pnand %p93_p4, %p90_p3 }
  0x11   :  { %98 = shalt.err (!%p95_p5)
}
  0x12   :  { %s99_s0 = scalar_lea.vmem %s27_s23, 256  ;;  %p104_p7 = scmp.lt.s32.totalorder %s27_s23, %s27_s23 }
  0x13   :  { %p100_p6 = scmp.ne.s32.totalorder %s27_s23, %s99_s0  ;;  %p105_p8 = scmp.lt.s32.totalorder %s99_s0, %s99_s0 }
  0x15   :  { %p106_p9 = por %p105_p8, %p104_p7 }
  0x17   :  { %p107_p10 = pnand %p106_p9, %p100_p6 }
  0x19   :  { %110 = shalt.err (!%p107_p10)
}
  0x1a   :  { %29 = dma.hbm_to_vmem [thread:$0]  %s236_s1, 256, %s27_s23, [#allocation3]  }
  0x1b   :  { %s111_s10 = scalar_lea.hbm %s237_s2, 256 }
  0x1c   :  { %p112_p11 = scmp.ne.s32.totalorder %s237_s2, %s111_s10  ;;  %p115_p12 = scmp.lt.u32.totalorder %s111_s10, %s237_s2 }
  0x1e   :  { %p117_p13 = pnand %p115_p12, %p112_p11 }
  0x20   :  { %120 = shalt.err (!%p117_p13)
}
  0x21   :  { %s121_s15 = scalar_lea.vmem %s37_s25, 256  ;;  %p126_p1 = scmp.lt.s32.totalorder %s37_s25, %s37_s25 }
  0x22   :  { %p122_p0 = scmp.ne.s32.totalorder %s37_s25, %s121_s15  ;;  %p127_p2 = scmp.lt.s32.totalorder %s121_s15, %s121_s15 }
  0x24   :  { %p128_p3 = por %p127_p2, %p126_p1 }
  0x26   :  { %p129_p4 = pnand %p128_p3, %p122_p0 }
  0x28   :  { %132 = shalt.err (!%p129_p4)
}
  0x29   :  { %39 = dma.hbm_to_vmem [thread:$0]  %s237_s2, 256, %s37_s25, [#allocation8]  }
  0x2a   :  { %155 = dma.done.wait [#allocation5], 16  }
  0x2b   :  { %156 = vsyncadd [#allocation5], 4294967280 }
  0x2c   :  { %157 = dma.done.wait [#allocation3], 256  }
  0x2d   :  { %158 = vsyncadd [#allocation3], 4294967040 }
  0x2e   :  { %159 = dma.done.wait [#allocation8], 256  }
  0x2f   :  { %160 = vsyncadd [#allocation8], 4294967040 }
  0x30   :  { %49 = sfence }
  0x31   :  { %v50_v0 = vld [vmem:[#allocation6] sm:$0xff]  ;;  %v52_v1 = vld [vmem:[#allocation7] sm:$0xff]  ;;  %v51_v2 = vld [vmem:[#allocation6 + $0x8] sm:$0xff]  ;;  %s166_s17 = smov [#allocation9]  }
  0x32   :  { %v54_v3 = vadd.f32 %v52_v1, %v50_v0  ;;  %v53_v4 = vld [vmem:[#allocation7 + $0x8] sm:$0xff]  ;;  %s64_s18 = sshll.u32 %s166_s17, 4  ;;  %s65_s18 = int_to_ptr.vmem [resolvable:$true] %s64_s18 }
  0x33   :  { %v55_v5 = vadd.f32 %v53_v4, %v51_v2  ;;  %s133_s19 = scalar_lea.vmem %s65_s18, 256  ;;  %p138_p6 = scmp.lt.s32.totalorder %s65_s18, %s65_s18 }
  0x34   :  { %56 = vst [vmem:[#allocation9] sm:$0xff] %v54_v3  ;;  %p134_p5 = scmp.ne.s32.totalorder %s65_s18, %s133_s19  ;;  %p139_p7 = scmp.lt.s32.totalorder %s133_s19, %s133_s19 }
  0x35   :  { %57 = vst [vmem:[#allocation9 + $0x8] sm:$0xff] %v55_v5 }
  0x36   :  { %p140_p8 = por %p139_p7, %p138_p6 }
  0x38   :  { %p141_p9 = pnand %p140_p8, %p134_p5 }
  0x3a   :  { %144 = shalt.err (!%p141_p9)
}
  0x3b   :  { %s145_s21 = scalar_lea.hbm %s238_s3, 256 }
  0x3c   :  { %p146_p10 = scmp.ne.s32.totalorder %s238_s3, %s145_s21  ;;  %p149_p11 = scmp.lt.u32.totalorder %s145_s21, %s238_s3 }
  0x3e   :  { %p151_p12 = pnand %p149_p11, %p146_p10 }
  0x40   :  { %154 = shalt.err (!%p151_p12)
}
  0x41   :  { %67 = dma.vmem_to_hbm [thread:$0]  %s65_s18, 256, %s238_s3, [#allocation4]  }
  0x42   :  { %161 = dma.done.wait [#allocation4], 256  }
  0x43   :  { %162 = vsyncadd [#allocation4], 4294967040 }
  0x44   :  { %71 = vsyncpa [#allocation3], 1 }
  0x45   :  { %72 = vsyncpa [#allocation8], 1 }
  0x46   :  { %73 = vsyncpa [#allocation4], 1 }
  0x47   :  { %74 = vsyncpa [#allocation5], 1 }

</bundles_post_ra>
